<compile_context>
chip_gen: v5e
topology: v5e:2x2
jax: 0.10.0
libtpu: 0.0.40
codegen_flags: <defaults>
</compile_context>

<pallas_src>
import functools

import jax
import jax.numpy as jnp
from jax import lax
from jax.experimental import pallas as pl
from jax.experimental.pallas import tpu as pltpu


def _cnn_kernel(x_ref, w_ref, o_ref, xp_ref, *, L, K, pad, tile_l):
    # x_ref : (B, L, H)          full activation, resident in VMEM
    # w_ref : (K*H, H)           im2col-repacked Conv1d weight, resident
    # o_ref : (B, tile_l, H)     output tile for this grid step
    # xp_ref: (B, L+2*pad, H)    zero-padded copy of x (VMEM scratch)
    B, _, H = x_ref.shape
    i = pl.program_id(0)

    # Build the zero-padded copy of x once (step 0).  The L-tile grid axis is
    # "arbitrary" (sequential), so the scratch persists for later tiles.
    @pl.when(i == 0)
    def _init():
        if pad > 0:
            xp_ref[:, :pad, :] = jnp.zeros((B, pad, H), xp_ref.dtype)
            xp_ref[:, pad + L:, :] = jnp.zeros((B, pad, H), xp_ref.dtype)
        xp_ref[:, pad:pad + L, :] = x_ref[...]

    r0 = pl.multiple_of(i * tile_l, tile_l)

    # im2col: the K shifted windows concatenated along the channel (lane)
    # axis -> (B*tile_l, K*H).  (Leading-dim reshapes only; no minor-dim
    # relayouts.)
    taps = [
        xp_ref[:, pl.ds(r0 + k, tile_l), :].reshape(B * tile_l, H)
        for k in range(K)
    ]
    xcol = jnp.concatenate(taps, axis=-1)            # (B*tile_l, K*H)

    # Single fused MXU matmul, f32 accumulation.
    acc = jnp.dot(xcol, w_ref[...], preferred_element_type=jnp.float32)

    # NOTE: with this toy H=32 the (.., H) store uses masked lanes; for
    # realistic hidden sizes (H a multiple of 128) this store is lane-dense.
    # Packing tile_l*H onto the lane axis would need a sublane->lane relayout
    # reshape, which is not portably supported, so we keep the direct store.
    o_ref[...] = acc.reshape(B, tile_l, H).astype(o_ref.dtype)


def cnn_forward(x, weight, *, compute_dtype=jnp.float32):
    """x: (B, L, H); weight: (H_out, H_in, K) in torch Conv1d layout."""
    B, L, H = x.shape
    H_out, H_in, K = weight.shape
    assert H_out == H and H_in == H, "CNN is a square hidden->hidden conv"
    # With pad=(K-1)//2, torch only preserves the sequence length for odd K.
    assert K % 2 == 1, "kernel_size must be odd"
    pad = (K - 1) // 2

    # Repack the weight for im2col: w_col[k*H + i, o] = weight[o, i, k].
    w_col = jnp.transpose(weight, (2, 1, 0)).reshape(K * H, H).astype(compute_dtype)
    x_c = x.astype(compute_dtype)

    # L-tiling: one fat tile at small L (grid == (1,)); for long sequences,
    # tile in chunks large enough to amortise the per-step fixed cost.
    max_tile = 512
    if L <= max_tile:
        tile_l = L
    else:
        divs = [d for d in range(8, max_tile + 1, 8) if L % d == 0]
        tile_l = max(divs) if divs else L
    num_tiles = L // tile_l

    out_dtype = x.dtype
    flops = 2 * B * L * H * H * K
    bytes_accessed = int(
        x_c.size * x_c.dtype.itemsize
        + w_col.size * w_col.dtype.itemsize
        + B * L * H * jnp.dtype(out_dtype).itemsize
    )
    cost = pl.CostEstimate(flops=flops, transcendentals=0,
                           bytes_accessed=bytes_accessed)

    itemsize_c = jnp.dtype(compute_dtype).itemsize
    vmem_need = (
        2 * x_c.size * itemsize_c                                   # resident x
        + 2 * w_col.size * itemsize_c                               # resident weight
        + 2 * B * tile_l * H * jnp.dtype(out_dtype).itemsize        # dbl-buffered out tile
        + B * (L + 2 * pad) * H * itemsize_c                        # padded scratch
    )
    vmem_limit = int(min(max(2 * vmem_need + (1 << 20), 16 << 20), 32 << 20))

    kernel = functools.partial(_cnn_kernel, L=L, K=K, pad=pad, tile_l=tile_l)

    return pl.pallas_call(
        kernel,
        out_shape=jax.ShapeDtypeStruct((B, L, H), out_dtype),
        grid_spec=pltpu.PrefetchScalarGridSpec(
            num_scalar_prefetch=0,
            grid=(num_tiles,),
            in_specs=[
                # x stays resident in VMEM across all L-tiles (constant index
                # map -> DMA'd once).  For very long sequences one would
                # stream (tile_l + K - 1)-row halo windows per step instead.
                pl.BlockSpec((B, L, H), lambda i: (0, 0, 0)),
                pl.BlockSpec((K * H, H), lambda i: (0, 0)),
            ],
            out_specs=pl.BlockSpec((B, tile_l, H), lambda i: (0, i, 0)),
            scratch_shapes=[pltpu.VMEM((B, L + 2 * pad, H), compute_dtype)],
        ),
        compiler_params=pltpu.CompilerParams(
            # "arbitrary": the padded-x scratch is built at step 0 and reused
            # by later steps, so the L-tile axis must run sequentially.  (At
            # these sizes the grid is (1,), so megacore sharding would be pure
            # overhead anyway; with per-tile halo DMAs this axis could be
            # marked "parallel" to use v7x's two TensorCores.)
            dimension_semantics=("arbitrary",),
            vmem_limit_bytes=vmem_limit,
        ),
        cost_estimate=cost,
    )(x_c, w_col)


def cnn_reference(x, weight):
    """Pure-JAX reference mirroring torch Conv1d semantics (NCL layout)."""
    x_ncl = jnp.transpose(x, (0, 2, 1))                         # (B, H, L)
    pad = (weight.shape[-1] - 1) // 2
    y = lax.conv_general_dilated(
        x_ncl, weight,
        window_strides=(1,), padding=[(pad, pad)],
        dimension_numbers=("NCH", "OIH", "NCH"))
    return jnp.transpose(y, (0, 2, 1))                          # (B, L, H)


if __name__ == "__main__":
    # config = {'hidden_size': 32, 'kernel_size': 3};  x: (batch, seq, hidden)
    B, L, H, K = 2, 8, 32, 3

    key = jax.random.PRNGKey(0)
    kx, kw = jax.random.split(key)
    x = jax.random.normal(kx, (B, L, H), dtype=jnp.float32)
    # Deterministic synthetic Conv1d weight, torch layout (out_ch, in_ch, K).
    weight = (jax.random.normal(kw, (H, H, K), dtype=jnp.float32)
              * (1.0 / jnp.sqrt(H * K)))

    # f32 path: exact module semantics.
    out = jax.block_until_ready(cnn_forward(x, weight))
    ref = cnn_reference(x, weight)
    assert out.shape == (B, L, H)
    assert jnp.allclose(out, ref, atol=2e-4, rtol=2e-4)

    # bf16-operand path (v6e/v7x MXU feedback): bf16 inputs, f32 accumulation,
    # f32 output.  Compared against a reference fed the same bf16-rounded
    # operands.
    out_bf16 = jax.block_until_ready(
        cnn_forward(x, weight, compute_dtype=jnp.bfloat16))
    ref_bf16 = cnn_reference(x.astype(jnp.bfloat16).astype(jnp.float32),
                             weight.astype(jnp.bfloat16).astype(jnp.float32))
    assert out_bf16.shape == (B, L, H)
    assert out_bf16.dtype == jnp.float32
    assert jnp.allclose(out_bf16, ref_bf16, atol=1e-2, rtol=1e-2)

    print("KERNEL_OK")
</pallas_src>

<mosaic_0001>
module attributes {stable_mosaic.version = 11 : i64} {
  func.func @_cnn_kernel(%arg0: i32, %arg1: memref<2x8x32xf32, #tpu.memory_space<vmem>>, %arg2: memref<96x32xf32, #tpu.memory_space<vmem>>, %arg3: memref<2x8x32xf32, #tpu.memory_space<vmem>>, %arg4: memref<2x10x32xf32, #tpu.memory_space<vmem>>) attributes {dimension_semantics = [#tpu.dimension_semantics<arbitrary>], iteration_bounds = array<i64: 1>, scalar_prefetch = 0 : i64, scratch_operands = 1 : i64, tpu.core_type = #tpu.core_type<tc>, window_params = [{pipeline_mode = #tpu.pipeline_mode<synchronous>, transform_indices = @transform_0, window_bounds = array<i64: 2, 8, 32>}, {pipeline_mode = #tpu.pipeline_mode<synchronous>, transform_indices = @transform_1, window_bounds = array<i64: 96, 32>}, {transform_indices = @transform_2, window_bounds = array<i64: 2, 8, 32>}]} {
    %c0_i32 = arith.constant 0 : i32
    %0 = arith.cmpi eq, %arg0, %c0_i32 : i32
    %1 = arith.extui %0 : i1 to i32
    %c0_i32_0 = arith.constant 0 : i32
    %2 = arith.cmpi ne, %1, %c0_i32_0 : i32
    scf.if %2 {
      %cst_12 = arith.constant 0.000000e+00 : f32
      %22 = vector.broadcast %cst_12 : f32 to vector<2x1x32xf32>
      %c0_13 = arith.constant 0 : index
      %c0_14 = arith.constant 0 : index
      %c0_15 = arith.constant 0 : index
      %23 = vector.load %arg4[%c0_13, %c0_14, %c0_15] : memref<2x10x32xf32, #tpu.memory_space<vmem>>, vector<2x1x32xf32>
      tpu.vector_store %arg4[%c0_13, %c0_14, %c0_15], %22 {strides = array<i32>} : memref<2x10x32xf32, #tpu.memory_space<vmem>>, vector<2x1x32xf32>,
      %cst_16 = arith.constant 0.000000e+00 : f32
      %24 = vector.broadcast %cst_16 : f32 to vector<2x1x32xf32>
      %c0_17 = arith.constant 0 : index
      %c9 = arith.constant 9 : index
      %c0_18 = arith.constant 0 : index
      %25 = vector.load %arg4[%c0_17, %c9, %c0_18] : memref<2x10x32xf32, #tpu.memory_space<vmem>>, vector<2x1x32xf32>
      tpu.vector_store %arg4[%c0_17, %c9, %c0_18], %24 {strides = array<i32>} : memref<2x10x32xf32, #tpu.memory_space<vmem>>, vector<2x1x32xf32>,
      %c0_19 = arith.constant 0 : index
      %c0_20 = arith.constant 0 : index
      %c0_21 = arith.constant 0 : index
      %26 = vector.load %arg1[%c0_19, %c0_20, %c0_21] : memref<2x8x32xf32, #tpu.memory_space<vmem>>, vector<2x8x32xf32>
      %c0_22 = arith.constant 0 : index
      %c1 = arith.constant 1 : index
      %c0_23 = arith.constant 0 : index
      %27 = vector.load %arg4[%c0_22, %c1, %c0_23] : memref<2x10x32xf32, #tpu.memory_space<vmem>>, vector<2x8x32xf32>
      tpu.vector_store %arg4[%c0_22, %c1, %c0_23], %26 {strides = array<i32>} : memref<2x10x32xf32, #tpu.memory_space<vmem>>, vector<2x8x32xf32>,
    } else {
    }
    %c8_i32 = arith.constant 8 : i32
    %3 = arith.muli %arg0, %c8_i32 : i32
    %4 = tpu.assume_multiple %3, 8 : i32
    %c0_i32_1 = arith.constant 0 : i32
    %5 = arith.addi %4, %c0_i32_1 : i32
    %c0 = arith.constant 0 : index
    %6 = arith.index_cast %5 : i32 to index
    %c0_2 = arith.constant 0 : index
    %7 = vector.load %arg4[%c0, %6, %c0_2] : memref<2x10x32xf32, #tpu.memory_space<vmem>>, vector<2x8x32xf32>
    %8 = vector.shape_cast %7 : vector<2x8x32xf32> to vector<16x32xf32>
    %c1_i32 = arith.constant 1 : i32
    %9 = arith.addi %4, %c1_i32 : i32
    %c0_3 = arith.constant 0 : index
    %10 = arith.index_cast %9 : i32 to index
    %c0_4 = arith.constant 0 : index
    %11 = vector.load %arg4[%c0_3, %10, %c0_4] : memref<2x10x32xf32, #tpu.memory_space<vmem>>, vector<2x8x32xf32>
    %12 = vector.shape_cast %11 : vector<2x8x32xf32> to vector<16x32xf32>
    %c2_i32 = arith.constant 2 : i32
    %13 = arith.addi %4, %c2_i32 : i32
    %c0_5 = arith.constant 0 : index
    %14 = arith.index_cast %13 : i32 to index
    %c0_6 = arith.constant 0 : index
    %15 = vector.load %arg4[%c0_5, %14, %c0_6] : memref<2x10x32xf32, #tpu.memory_space<vmem>>, vector<2x8x32xf32>
    %16 = vector.shape_cast %15 : vector<2x8x32xf32> to vector<16x32xf32>
    %17 = tpu.concatenate %8, %12, %16 in 1 : vector<16x32xf32>, vector<16x32xf32>, vector<16x32xf32> -> vector<16x96xf32>
    %c0_7 = arith.constant 0 : index
    %c0_8 = arith.constant 0 : index
    %18 = vector.load %arg2[%c0_7, %c0_8] : memref<96x32xf32, #tpu.memory_space<vmem>>, vector<96x32xf32>
    %cst = arith.constant dense<0.000000e+00> : vector<16x32xf32>
    %19 = tpu.matmul %17, %18, %cst {dimension_numbers = #tpu.dot_dimension_numbers<[1], [0], [0], [1], [0, 0, 1, 1], [], []>} : vector<16x96xf32>, vector<96x32xf32>, vector<16x32xf32> -> vector<16x32xf32>
    %20 = vector.shape_cast %19 : vector<16x32xf32> to vector<2x8x32xf32>
    %c0_9 = arith.constant 0 : index
    %c0_10 = arith.constant 0 : index
    %c0_11 = arith.constant 0 : index
    %21 = vector.load %arg3[%c0_9, %c0_10, %c0_11] : memref<2x8x32xf32, #tpu.memory_space<vmem>>, vector<2x8x32xf32>
    tpu.vector_store %arg3[%c0_9, %c0_10, %c0_11], %20 {strides = array<i32>} : memref<2x8x32xf32, #tpu.memory_space<vmem>>, vector<2x8x32xf32>,
    return
  }
  func.func @transform_0(%arg0: i32) -> (i32, i32, i32) {
    %c0_i32 = arith.constant 0 : i32
    %c0_i32_0 = arith.constant 0 : i32
    %c0_i32_1 = arith.constant 0 : i32
    %c0_i32_2 = arith.constant 0 : i32
    return %c0_i32, %c0_i32_0, %c0_i32_1 : i32, i32, i32
  }
  func.func @transform_1(%arg0: i32) -> (i32, i32) {
    %c0_i32 = arith.constant 0 : i32
    %c0_i32_0 = arith.constant 0 : i32
    %c0_i32_1 = arith.constant 0 : i32
    return %c0_i32, %c0_i32_0 : i32, i32
  }
  func.func @transform_2(%arg0: i32) -> (i32, i32, i32) {
    %c0_i32 = arith.constant 0 : i32
    %c0_i32_0 = arith.constant 0 : i32
    %c0_i32_1 = arith.constant 0 : i32
    return %c0_i32, %arg0, %c0_i32_0 : i32, i32, i32
  }
}

</mosaic_0001>

<bundles_post_ra>
// kernel: tpu_custom_call.1
= control target key start
LH: loop header
LB: loop body
LE: loop exit
PB: predicated region body
PF: predicated region fallthrough
CT: control target
= control target key end

     0   :  { %vm23_vm0 = vcmask 261120   ;;  %vm16_vm1 = vcmask 253952   ;;  %v170_v3 = vmov 0.0   ;;  %s242_s0 = inlined_call_operand.vmem [shape: f32[2,8,32], index: 0, kind: input, shape index: {}]   ;;  %s243_s1 = inlined_call_operand.vmem [shape: f32[96,32], index: 1, kind: input, shape index: {}]   ;;  %s244_s2 = inlined_call_operand.hbm [shape: f32[2,8,32], index: 2, kind: output, shape index: {}]  }
   0x1   :  { %v21_v0 = vld [vmem:[%s242_s0] sm:$0xff]  ;;  %v71_v1 = vld [vmem:[%s243_s1 + $0x58] sm:$0xff]  ;;  %v70_v2 = vld [vmem:[%s243_s1 + $0x50] sm:$0xff]  ;;  %19 = vst.msk [vmem:[#allocation2 + $0x9] sm:$0x1] %vm16_vm1, %v170_v3 }
   0x2   :  { %24 = vst.msk [vmem:[#allocation2 + $0x1] sm:$0xff] %vm23_vm0, %v21_v0  ;;  %83 = vmatpush.msra.mxu0 %v71_v1  ;;  %126 = vmatpush.msra.mxu1 %v71_v1  ;;  %v22_v4 = vld [vmem:[%s242_s0 + $0x8] sm:$0xff]  ;;  %v68_v6 = vld [vmem:[%s243_s1 + $0x40] sm:$0xff] }
   0x3   :  { %17 = vst.msk [vmem:[#allocation2] sm:$0x1] %vm16_vm1, %v170_v3  ;;  %v69_v5 = vld [vmem:[%s243_s1 + $0x48] sm:$0xff] }
   0x4   :  { %18 = vst.msk [vmem:[#allocation2 + $0x10] sm:$0x1] %vm16_vm1, %v170_v3  ;;  %84 = vmatpush.msra.mxu0 %v70_v2  ;;  %127 = vmatpush.msra.mxu1 %v70_v2 }
   0x5   :  { %20 = vst.msk [vmem:[#allocation2 + $0x19] sm:$0x1] %vm16_vm1, %v170_v3 }
   0x6   :  { %7 = vsyncpa [#allocation4], 0  ;;  %25 = vst.msk [vmem:[#allocation2 + $0x11] sm:$0xff] %vm23_vm0, %v22_v4  ;;  %85 = vmatpush.msra.mxu0 %v69_v5  ;;  %128 = vmatpush.msra.mxu1 %v69_v5  ;;  %v67_v7 = vld [vmem:[%s243_s1 + $0x38] sm:$0xff]  ;;  %s171_s0 = smov 32   ;;  %v66_v10 = vld [vmem:[%s243_s1 + $0x30] sm:$0xff] }
   0x7   :  { %s172_s25 = smov 64   ;;  %v65_v11 = vld [vmem:[%s243_s1 + $0x28] sm:$0xff]  ;;  %v64_v12 = vld [vmem:[%s243_s1 + $0x20] sm:$0xff]  ;;  %v63_v15 = vld [vmem:[%s243_s1 + $0x18] sm:$0xff]  ;;  %vm57_vm2 = vcmask 523264   ;;  %vm72_vm3 = vcmask 785408  }
   0x8   :  { %86 = vmatpush.msra.mxu0 %v68_v6  ;;  %129 = vmatpush.msra.mxu1 %v68_v6  ;;  %v62_v16 = vld [vmem:[%s243_s1 + $0x10] sm:$0xff]  ;;  %v61_v17 = vld [vmem:[%s243_s1 + $0x8] sm:$0xff]  ;;  %v60_v18 = vld [vmem:[%s243_s1] sm:$0xff]  ;;  %s173_s1 = smov [#allocation3]   ;;  %s110_s13 = sshll.u32 %s244_s2, 4  ;;  %s111_s13 = int_to_ptr.hbm [resolvable:$true] %s110_s13 }
   0x9   :  { %v32_v8 = vld [vmem:[#allocation2 + $0x1] sm:$0xff]  ;;  %s108_s10 = sshll.u32 %s173_s1, 4  ;;  %s174_s14 = smov 128   ;;  %s109_s10 = int_to_ptr.vmem [resolvable:$true] %s108_s10 }
   0xa   :  { %40 = vrot.lane.b32.xlu0 %v32_v8, %s171_s0  ;;  %v36_v9 = vld [vmem:[#allocation2 + $0x2] sm:$0xff]  ;;  %87 = vmatpush.msra.mxu0 %v67_v7  ;;  %s175_s15 = smov 8  }
   0xb   :  { %48 = vrot.lane.b32.xlu1 %v36_v9, %s172_s25  ;;  %130 = vmatpush.msra.mxu1 %v67_v7  ;;  %v28_v19 = vld [vmem:[#allocation2] sm:$0xff] }
   0xc   :  { %88 = vmatpush.msra.mxu0 %v66_v10 }
   0xd   :  { %131 = vmatpush.msra.mxu1 %v66_v10  ;;  %v33_v13 = vld [vmem:[#allocation2 + $0x11] sm:$0xff] }
   0xe   :  { %89 = vmatpush.msra.mxu0 %v65_v11  ;;  %v37_v14 = vld [vmem:[#allocation2 + $0x12] sm:$0xff] }
   0xf   :  { %132 = vmatpush.msra.mxu1 %v65_v11  ;;  %v29_v24 = vld [vmem:[#allocation2 + $0x10] sm:$0xff] }
  0x10   :  { %90 = vmatpush.msra.mxu0 %v64_v12 }
  0x11   :  { %133 = vmatpush.msra.mxu1 %v64_v12 }
  0x12   :  { %42 = vrot.lane.b32.xlu0 %v33_v13, %s171_s0  ;;  %91 = vmatpush.msra.mxu0 %v63_v15 }
  0x13   :  { %50 = vrot.lane.b32.xlu1 %v37_v14, %s172_s25  ;;  %134 = vmatpush.msra.mxu1 %v63_v15 }
  0x14   :  { %92 = vmatpush.msra.mxu0 %v62_v16 }
  0x15   :  { %135 = vmatpush.msra.mxu1 %v62_v16 }
  0x16   :  { %93 = vmatpush.msra.mxu0 %v61_v17 }
  0x17   :  { %136 = vmatpush.msra.mxu1 %v61_v17 }
  0x18   :  { %94 = vmatpush.msra.mxu0 %v60_v18 }
  0x19   :  { %137 = vmatpush.msra.mxu1 %v60_v18 }
  0x7c   :  { %v41_v20 = vpop.permute.xlu0 %40 }
  0x7d   :  { %v55_v21 = vsel %vm23_vm0, %v28_v19, %v41_v20  ;;  %v49_v22 = vpop.permute.xlu1 %48 }
  0x7e   :  { %v58_v23 = vsel %vm57_vm2, %v55_v21, %v49_v22 }
  0x7f   :  { %124 = vmatmul.msk.f32.vlgmr.msra.gmra.mxu0 %vm72_vm3, %v58_v23 }
  0x84   :  { %v43_v25 = vpop.permute.xlu0 %42 }
  0x85   :  { %v56_v26 = vsel %vm23_vm0, %v29_v24, %v43_v25  ;;  %v51_v27 = vpop.permute.xlu1 %50 }
  0x86   :  { %v59_v28 = vsel %vm57_vm2, %v56_v26, %v51_v27 }
  0x87   :  { %125 = vmatmul.msk.f32.vlgmr.msra.gmra.mxu1 %vm72_vm3, %v59_v28 }
  0xfc   :  { %v96_v29 = vpop.f32.mrf.mxu0 }
  0xfd   :  { %102 = vst.msk [vmem:[#allocation3] sm:$0xff] %vm23_vm0, %v96_v29 }
 0x104   :  { %v99_v30 = vpop.f32.mrf.mxu1 }
 0x105   :  { %103 = vst.msk [vmem:[#allocation3 + $0x8] sm:$0xff] %vm23_vm0, %v99_v30 }
 0x106   :  { %116 = dma.vmem_to_hbm [thread:$0]  %s109_s10, 256, %s111_s13, [#allocation4], %s174_s14, %s174_s14, %s175_s15  }
 0x107   :  { %168 = dma.done.wait [#allocation4], 256  }
 0x108   :  { %169 = vsyncadd [#allocation4], 4294967040 }
 0x109   :  { %121 = vsyncpa [#allocation4], 1 }

</bundles_post_ra>
